<compile_context>
chip_gen: v7x
topology: tpu7x:2x2x1
jax: 0.10.0
libtpu: 0.0.40
codegen_flags: <defaults>
</compile_context>

<pallas_src>
import math

import numpy as np
import jax
import jax.numpy as jnp
from jax import lax
from jax.experimental import pallas as pl
from jax.experimental.pallas import tpu as pltpu

# ---- model hyperparameters (small, consistent with the module) -------------
B = 2          # batch
T = 8          # sequence length (n_ctx)
C = 32         # n_embd
H = 4          # n_head
D = C // H     # head dim
BT = B * T     # flattened rows
EPS = 1e-5     # layer_norm_epsilon
SCALE = False  # Block default: Attention(..., scale=False)

# Rows of the packed "small operand" slab, shape (8, 4*C) = (8, 128) f32.
_R_LN1G, _R_LN1B, _R_LN2G, _R_LN2B = 0, 1, 2, 3
_R_BPROJ, _R_BPROJ2, _R_BQKV, _R_BFC = 4, 5, 6, 7

# Compile-time block-diagonal mask for the head-stacked score tile
# (H*BT, BT): rows are [head0 | head1 | ...], each block row r has batch r//T.
_rb = (np.arange(H * BT) % BT) // T
_cb = np.arange(BT) // T
NEG_MASK = np.where(_rb[:, None] == _cb[None, :], 0.0, -1e30).astype(np.float32)


def _gelu_new(x):
    # GPT-2 "gelu_new": 0.5*x*(1+tanh(sqrt(2/pi)*(x + 0.044715*x^3)))
    return 0.5 * x * (1.0 + jnp.tanh(
        math.sqrt(2.0 / math.pi) * (x + 0.044715 * x * x * x)))


def _layernorm(x, gamma, beta):
    mu = jnp.mean(x, axis=-1, keepdims=True)
    var = jnp.mean((x - mu) ** 2, axis=-1, keepdims=True)
    return (x - mu) * jax.lax.rsqrt(var + EPS) * gamma + beta


def block_kernel(x_ref, mask_ref, small_ref,
                 wqkv_ref, wproj_ref, wfc_ref, wproj2_ref,
                 out_ref):
    f32, bf16 = jnp.float32, jnp.bfloat16
    x = x_ref[...]                                   # (BT, C), rows = (b, t)

    # ---- ln_1 ----
    h1 = _layernorm(x,
                    small_ref[_R_LN1G:_R_LN1G + 1, :C],
                    small_ref[_R_LN1B:_R_LN1B + 1, :C])

    # ---- fused QKV projection: one MXU push (M=BT, K=C, N=3C) ----
    qkv = jnp.dot(h1.astype(bf16), wqkv_ref[...],
                  preferred_element_type=f32)
    qkv = qkv + small_ref[_R_BQKV:_R_BQKV + 1, :3 * C]          # (BT, 3C) f32
    qkv_bf = qkv.astype(bf16)

    # ---- per-head scores, transpose-free (contract dim 1 with dim 1) ------
    scores = []
    for hh in range(H):
        qh = qkv_bf[:, hh * D:(hh + 1) * D]                     # (BT, D)
        kh = qkv_bf[:, C + hh * D:C + (hh + 1) * D]             # (BT, D)
        s_h = lax.dot_general(qh, kh, (((1,), (1,)), ((), ())),
                              preferred_element_type=f32)       # (BT, BT)
        scores.append(s_h)
    s_all = jnp.concatenate(scores, axis=0)                     # (H*BT, BT)
    if SCALE:
        s_all = s_all * (1.0 / math.sqrt(D))
    s_all = s_all + mask_ref[...]                               # block-diag mask

    # ---- softmax batched across heads: 1 max / 1 exp / 1 sum / 1 rcp ------
    s_all = s_all - jnp.max(s_all, axis=-1, keepdims=True)
    p_all = jnp.exp(s_all)
    p_all = p_all * pl.reciprocal(jnp.sum(p_all, axis=-1, keepdims=True),
                                  approx=True)
    p_bf = p_all.astype(bf16)                                   # (H*BT, BT)

    # ---- AV + folded merge_heads/c_proj: sum_h (p_h @ v_h) @ Wproj_h ------
    acc = None
    for hh in range(H):
        ph = p_bf[hh * BT:(hh + 1) * BT, :]                     # (BT, BT)
        vh = qkv_bf[:, 2 * C + hh * D:2 * C + (hh + 1) * D]     # (BT, D)
        ah = jnp.dot(ph, vh, preferred_element_type=f32)        # (BT, D) f32
        wph = wproj_ref[hh * D:(hh + 1) * D, :]                 # (D, C) f32, aligned
        contrib = jnp.dot(ah.astype(bf16), wph.astype(bf16),
                          preferred_element_type=f32)           # (BT, C)
        acc = contrib if acc is None else acc + contrib

    x1 = x + acc + small_ref[_R_BPROJ:_R_BPROJ + 1, :C]         # residual 1

    # ---- ln_2 + MLP (C -> 4C -> C) + residual ----
    h2 = _layernorm(x1,
                    small_ref[_R_LN2G:_R_LN2G + 1, :C],
                    small_ref[_R_LN2B:_R_LN2B + 1, :C])
    m = jnp.dot(h2.astype(bf16), wfc_ref[...],
                preferred_element_type=f32)                     # (BT, 4C)
    m = _gelu_new(m + small_ref[_R_BFC:_R_BFC + 1, :])
    y = jnp.dot(m.astype(bf16), wproj2_ref[...],
                preferred_element_type=f32)                     # (BT, C)
    y = y + small_ref[_R_BPROJ2:_R_BPROJ2 + 1, :C]

    out_ref[...] = (x1 + y).astype(out_ref.dtype)


def block_forward(x, params):
    """x: (B, T, C) float32. params: dict of weights (see init_params)."""
    x2d = x.reshape(BT, C)                            # free reshape outside
    vmem = pl.BlockSpec(memory_space=pltpu.MemorySpace.VMEM)
    out2d = pl.pallas_call(
        block_kernel,
        out_shape=jax.ShapeDtypeStruct((BT, C), jnp.float32),
        in_specs=[vmem] * 7,
        out_specs=vmem,
    )(x2d,
      jnp.asarray(NEG_MASK),
      params["small"],
      params["wqkv"], params["wproj"], params["wfc"], params["wproj2"])
    return out2d.reshape(B, T, C)


def init_params(key):
    # Conv1D weights ~ N(0, 0.02).  Gammas/betas/biases get small random
    # values (instead of the torch ones/zeros defaults) so the packed-slab
    # indexing and every bias add are actually exercised by the check.
    std = 0.02
    ks = jax.random.split(key, 12)
    p = dict(
        ln1_g=(1.0 + 0.1 * jax.random.normal(ks[0], (1, C))).astype(jnp.float32),
        ln1_b=(0.1 * jax.random.normal(ks[1], (1, C))).astype(jnp.float32),
        ln2_g=(1.0 + 0.1 * jax.random.normal(ks[2], (1, C))).astype(jnp.float32),
        ln2_b=(0.1 * jax.random.normal(ks[3], (1, C))).astype(jnp.float32),
        wqkv=(std * jax.random.normal(ks[4], (C, 3 * C))).astype(jnp.bfloat16),
        bqkv=(std * jax.random.normal(ks[5], (1, 3 * C))).astype(jnp.float32),
        wproj=(std * jax.random.normal(ks[6], (C, C))).astype(jnp.float32),
        bproj=(std * jax.random.normal(ks[7], (1, C))).astype(jnp.float32),
        wfc=(std * jax.random.normal(ks[8], (C, 4 * C))).astype(jnp.bfloat16),
        bfc=(std * jax.random.normal(ks[9], (1, 4 * C))).astype(jnp.float32),
        wproj2=(std * jax.random.normal(ks[10], (4 * C, C))).astype(jnp.bfloat16),
        bproj2=(std * jax.random.normal(ks[11], (1, C))).astype(jnp.float32),
    )
    # Pack the eight tiny vector operands into one (8, 4C) = (8, 128) slab.
    slab = jnp.zeros((8, 4 * C), jnp.float32)
    slab = slab.at[_R_LN1G, :C].set(p["ln1_g"][0])
    slab = slab.at[_R_LN1B, :C].set(p["ln1_b"][0])
    slab = slab.at[_R_LN2G, :C].set(p["ln2_g"][0])
    slab = slab.at[_R_LN2B, :C].set(p["ln2_b"][0])
    slab = slab.at[_R_BPROJ, :C].set(p["bproj"][0])
    slab = slab.at[_R_BPROJ2, :C].set(p["bproj2"][0])
    slab = slab.at[_R_BQKV, :3 * C].set(p["bqkv"][0])
    slab = slab.at[_R_BFC, :].set(p["bfc"][0])
    p["small"] = slab
    return p


def block_reference(x, p):
    """Pure-JAX f32 reference mirroring the PyTorch Block forward (eval mode).

    Uses the exact same (bf16-stored) weight values, upcast to f32, so the
    comparison isolates in-kernel error (bf16 MXU operands + approx rcp).
    """
    wqkv = p["wqkv"].astype(jnp.float32)
    wproj = p["wproj"].astype(jnp.float32)
    wfc = p["wfc"].astype(jnp.float32)
    wproj2 = p["wproj2"].astype(jnp.float32)

    h = _layernorm(x, p["ln1_g"], p["ln1_b"])
    qkv = h @ wqkv + p["bqkv"]
    q, k, v = jnp.split(qkv, 3, axis=-1)
    split = lambda t: t.reshape(B, T, H, D).transpose(0, 2, 1, 3)  # (B,H,T,D)
    qh, kh, vh = split(q), split(k), split(v)
    s = jnp.einsum("bhtd,bhsd->bhts", qh, kh)
    if SCALE:
        s = s / math.sqrt(D)
    w = jax.nn.softmax(s, axis=-1)
    a = jnp.einsum("bhts,bhsd->bhtd", w, vh)
    a = a.transpose(0, 2, 1, 3).reshape(B, T, C)
    a = a @ wproj + p["bproj"]
    x1 = x + a
    m = _gelu_new(_layernorm(x1, p["ln2_g"], p["ln2_b"]) @ wfc + p["bfc"])
    m = m @ wproj2 + p["bproj2"]
    return x1 + m


if __name__ == "__main__":
    key = jax.random.PRNGKey(0)
    kx, kp = jax.random.split(key)
    x = jax.random.normal(kx, (B, T, C), jnp.float32)
    params = init_params(kp)

    out = jax.block_until_ready(block_forward(x, params))
    ref = block_reference(x, params)

    assert out.shape == (B, T, C)
    err = jnp.max(jnp.abs(out - ref))
    # bf16 MXU operands + approx-reciprocal softmax denominator introduce
    # ~1e-4..1e-3-level error vs. the all-f32 reference.
    assert jnp.allclose(out, ref, atol=2e-3, rtol=2e-3), f"max abs err {err}"

    print("KERNEL_OK")
</pallas_src>

<mosaic_0001>
module attributes {stable_mosaic.version = 11 : i64} {
  func.func @block_kernel(%arg0: memref<16x32xf32, #tpu.memory_space<vmem>>, %arg1: memref<64x16xf32, #tpu.memory_space<vmem>>, %arg2: memref<8x128xf32, #tpu.memory_space<vmem>>, %arg3: memref<32x96xbf16, #tpu.memory_space<vmem>>, %arg4: memref<32x32xf32, #tpu.memory_space<vmem>>, %arg5: memref<32x128xbf16, #tpu.memory_space<vmem>>, %arg6: memref<128x32xbf16, #tpu.memory_space<vmem>>, %arg7: memref<16x32xf32, #tpu.memory_space<vmem>>) attributes {dimension_semantics = [], scalar_prefetch = 0 : i64, scratch_operands = 0 : i64, tpu.core_type = #tpu.core_type<tc>} {
    %c0 = arith.constant 0 : index
    %c0_0 = arith.constant 0 : index
    %0 = vector.load %arg0[%c0, %c0_0] : memref<16x32xf32, #tpu.memory_space<vmem>>, vector<16x32xf32>
    %c0_1 = arith.constant 0 : index
    %c0_2 = arith.constant 0 : index
    %1 = vector.load %arg2[%c0_1, %c0_2] : memref<8x128xf32, #tpu.memory_space<vmem>>, vector<1x32xf32>
    %c1 = arith.constant 1 : index
    %c0_3 = arith.constant 0 : index
    %2 = vector.load %arg2[%c1, %c0_3] : memref<8x128xf32, #tpu.memory_space<vmem>>, vector<1x32xf32>
    %cst = arith.constant dense<0.000000e+00> : vector<16xf32>
    %3 = vector.multi_reduction <add>, %0, %cst [1] : vector<16x32xf32> to vector<16xf32>
    %4 = vector.shape_cast %3 : vector<16xf32> to vector<16x1xf32>
    %cst_4 = arith.constant 3.200000e+01 : f32
    %5 = vector.broadcast %cst_4 : f32 to vector<16x1xf32>
    %6 = arith.divf %4, %5 : vector<16x1xf32>
    %7 = vector.broadcast %6 : vector<16x1xf32> to vector<16x32xf32>
    %8 = arith.subf %0, %7 : vector<16x32xf32>
    %9 = arith.mulf %8, %8 : vector<16x32xf32>
    %cst_5 = arith.constant dense<0.000000e+00> : vector<16xf32>
    %10 = vector.multi_reduction <add>, %9, %cst_5 [1] : vector<16x32xf32> to vector<16xf32>
    %11 = vector.shape_cast %10 : vector<16xf32> to vector<16x1xf32>
    %cst_6 = arith.constant 3.200000e+01 : f32
    %12 = vector.broadcast %cst_6 : f32 to vector<16x1xf32>
    %13 = arith.divf %11, %12 : vector<16x1xf32>
    %14 = vector.broadcast %6 : vector<16x1xf32> to vector<16x32xf32>
    %15 = arith.subf %0, %14 : vector<16x32xf32>
    %cst_7 = arith.constant 9.99999974E-6 : f32
    %16 = vector.broadcast %cst_7 : f32 to vector<16x1xf32>
    %17 = arith.addf %13, %16 : vector<16x1xf32>
    %18 = math.rsqrt %17 : vector<16x1xf32>
    %19 = vector.broadcast %18 : vector<16x1xf32> to vector<16x32xf32>
    %20 = arith.mulf %15, %19 : vector<16x32xf32>
    %21 = vector.broadcast %1 : vector<1x32xf32> to vector<16x32xf32>
    %22 = arith.mulf %20, %21 : vector<16x32xf32>
    %23 = vector.broadcast %2 : vector<1x32xf32> to vector<16x32xf32>
    %24 = arith.addf %22, %23 : vector<16x32xf32>
    %25 = arith.truncf %24 : vector<16x32xf32> to vector<16x32xbf16>
    %c0_8 = arith.constant 0 : index
    %c0_9 = arith.constant 0 : index
    %26 = vector.load %arg3[%c0_8, %c0_9] : memref<32x96xbf16, #tpu.memory_space<vmem>>, vector<32x96xbf16>
    %cst_10 = arith.constant dense<0.000000e+00> : vector<16x96xf32>
    %27 = tpu.matmul %25, %26, %cst_10 {dimension_numbers = #tpu.dot_dimension_numbers<[1], [0], [0], [1], [0, 0, 1, 1], [], []>} : vector<16x32xbf16>, vector<32x96xbf16>, vector<16x96xf32> -> vector<16x96xf32>
    %c6 = arith.constant 6 : index
    %c0_11 = arith.constant 0 : index
    %28 = vector.load %arg2[%c6, %c0_11] : memref<8x128xf32, #tpu.memory_space<vmem>>, vector<1x96xf32>
    %29 = vector.broadcast %28 : vector<1x96xf32> to vector<16x96xf32>
    %30 = arith.addf %27, %29 : vector<16x96xf32>
    %31 = arith.truncf %30 : vector<16x96xf32> to vector<16x96xbf16>
    %32 = vector.extract_strided_slice %31 {offsets = [0, 0], sizes = [16, 8], strides = [1, 1]} : vector<16x96xbf16> to vector<16x8xbf16>
    %33 = vector.extract_strided_slice %31 {offsets = [0, 32], sizes = [16, 8], strides = [1, 1]} : vector<16x96xbf16> to vector<16x8xbf16>
    %cst_12 = arith.constant dense<0.000000e+00> : vector<16x16xf32>
    %34 = tpu.matmul %32, %33, %cst_12 {dimension_numbers = #tpu.dot_dimension_numbers<[1], [1], [0], [0], [0, 0, 1, 0], [], []>} : vector<16x8xbf16>, vector<16x8xbf16>, vector<16x16xf32> -> vector<16x16xf32>
    %35 = vector.extract_strided_slice %31 {offsets = [0, 8], sizes = [16, 8], strides = [1, 1]} : vector<16x96xbf16> to vector<16x8xbf16>
    %36 = vector.extract_strided_slice %31 {offsets = [0, 40], sizes = [16, 8], strides = [1, 1]} : vector<16x96xbf16> to vector<16x8xbf16>
    %cst_13 = arith.constant dense<0.000000e+00> : vector<16x16xf32>
    %37 = tpu.matmul %35, %36, %cst_13 {dimension_numbers = #tpu.dot_dimension_numbers<[1], [1], [0], [0], [0, 0, 1, 0], [], []>} : vector<16x8xbf16>, vector<16x8xbf16>, vector<16x16xf32> -> vector<16x16xf32>
    %38 = vector.extract_strided_slice %31 {offsets = [0, 16], sizes = [16, 8], strides = [1, 1]} : vector<16x96xbf16> to vector<16x8xbf16>
    %39 = vector.extract_strided_slice %31 {offsets = [0, 48], sizes = [16, 8], strides = [1, 1]} : vector<16x96xbf16> to vector<16x8xbf16>
    %cst_14 = arith.constant dense<0.000000e+00> : vector<16x16xf32>
    %40 = tpu.matmul %38, %39, %cst_14 {dimension_numbers = #tpu.dot_dimension_numbers<[1], [1], [0], [0], [0, 0, 1, 0], [], []>} : vector<16x8xbf16>, vector<16x8xbf16>, vector<16x16xf32> -> vector<16x16xf32>
    %41 = vector.extract_strided_slice %31 {offsets = [0, 24], sizes = [16, 8], strides = [1, 1]} : vector<16x96xbf16> to vector<16x8xbf16>
    %42 = vector.extract_strided_slice %31 {offsets = [0, 56], sizes = [16, 8], strides = [1, 1]} : vector<16x96xbf16> to vector<16x8xbf16>
    %cst_15 = arith.constant dense<0.000000e+00> : vector<16x16xf32>
    %43 = tpu.matmul %41, %42, %cst_15 {dimension_numbers = #tpu.dot_dimension_numbers<[1], [1], [0], [0], [0, 0, 1, 0], [], []>} : vector<16x8xbf16>, vector<16x8xbf16>, vector<16x16xf32> -> vector<16x16xf32>
    %44 = tpu.concatenate %34, %37, %40, %43 in 0 : vector<16x16xf32>, vector<16x16xf32>, vector<16x16xf32>, vector<16x16xf32> -> vector<64x16xf32>
    %c0_16 = arith.constant 0 : index
    %c0_17 = arith.constant 0 : index
    %45 = vector.load %arg1[%c0_16, %c0_17] : memref<64x16xf32, #tpu.memory_space<vmem>>, vector<64x16xf32>
    %46 = arith.addf %44, %45 : vector<64x16xf32>
    %cst_18 = arith.constant dense<0xFF800000> : vector<64xf32>
    %47 = vector.multi_reduction <maximumf>, %46, %cst_18 [1] : vector<64x16xf32> to vector<64xf32>
    %48 = vector.shape_cast %47 : vector<64xf32> to vector<64x1xf32>
    %49 = vector.broadcast %48 : vector<64x1xf32> to vector<64x16xf32>
    %50 = arith.subf %46, %49 : vector<64x16xf32>
    %51 = math.exp %50 : vector<64x16xf32>
    %cst_19 = arith.constant dense<0.000000e+00> : vector<64xf32>
    %52 = vector.multi_reduction <add>, %51, %cst_19 [1] : vector<64x16xf32> to vector<64xf32>
    %53 = vector.shape_cast %52 : vector<64xf32> to vector<64x1xf32>
    %54 = tpu.reciprocal %53 {approx = true} : vector<64x1xf32> -> vector<64x1xf32>
    %55 = vector.broadcast %54 : vector<64x1xf32> to vector<64x16xf32>
    %56 = arith.mulf %51, %55 : vector<64x16xf32>
    %57 = arith.truncf %56 : vector<64x16xf32> to vector<64x16xbf16>
    %58 = vector.extract_strided_slice %57 {offsets = [0, 0], sizes = [16, 16], strides = [1, 1]} : vector<64x16xbf16> to vector<16x16xbf16>
    %59 = vector.extract_strided_slice %31 {offsets = [0, 64], sizes = [16, 8], strides = [1, 1]} : vector<16x96xbf16> to vector<16x8xbf16>
    %cst_20 = arith.constant dense<0.000000e+00> : vector<16x8xf32>
    %60 = tpu.matmul %58, %59, %cst_20 {dimension_numbers = #tpu.dot_dimension_numbers<[1], [0], [0], [1], [0, 0, 1, 1], [], []>} : vector<16x16xbf16>, vector<16x8xbf16>, vector<16x8xf32> -> vector<16x8xf32>
    %c0_21 = arith.constant 0 : index
    %c0_22 = arith.constant 0 : index
    %61 = vector.load %arg4[%c0_21, %c0_22] : memref<32x32xf32, #tpu.memory_space<vmem>>, vector<8x32xf32>
    %62 = arith.truncf %60 : vector<16x8xf32> to vector<16x8xbf16>
    %63 = arith.truncf %61 : vector<8x32xf32> to vector<8x32xbf16>
    %cst_23 = arith.constant dense<0.000000e+00> : vector<16x32xf32>
    %64 = tpu.matmul %62, %63, %cst_23 {dimension_numbers = #tpu.dot_dimension_numbers<[1], [0], [0], [1], [0, 0, 1, 1], [], []>} : vector<16x8xbf16>, vector<8x32xbf16>, vector<16x32xf32> -> vector<16x32xf32>
    %65 = vector.extract_strided_slice %57 {offsets = [16, 0], sizes = [16, 16], strides = [1, 1]} : vector<64x16xbf16> to vector<16x16xbf16>
    %66 = vector.extract_strided_slice %31 {offsets = [0, 72], sizes = [16, 8], strides = [1, 1]} : vector<16x96xbf16> to vector<16x8xbf16>
    %cst_24 = arith.constant dense<0.000000e+00> : vector<16x8xf32>
    %67 = tpu.matmul %65, %66, %cst_24 {dimension_numbers = #tpu.dot_dimension_numbers<[1], [0], [0], [1], [0, 0, 1, 1], [], []>} : vector<16x16xbf16>, vector<16x8xbf16>, vector<16x8xf32> -> vector<16x8xf32>
    %c8 = arith.constant 8 : index
    %c0_25 = arith.constant 0 : index
    %68 = vector.load %arg4[%c8, %c0_25] : memref<32x32xf32, #tpu.memory_space<vmem>>, vector<8x32xf32>
    %69 = arith.truncf %67 : vector<16x8xf32> to vector<16x8xbf16>
    %70 = arith.truncf %68 : vector<8x32xf32> to vector<8x32xbf16>
    %cst_26 = arith.constant dense<0.000000e+00> : vector<16x32xf32>
    %71 = tpu.matmul %69, %70, %cst_26 {dimension_numbers = #tpu.dot_dimension_numbers<[1], [0], [0], [1], [0, 0, 1, 1], [], []>} : vector<16x8xbf16>, vector<8x32xbf16>, vector<16x32xf32> -> vector<16x32xf32>
    %72 = arith.addf %64, %71 : vector<16x32xf32>
    %73 = vector.extract_strided_slice %57 {offsets = [32, 0], sizes = [16, 16], strides = [1, 1]} : vector<64x16xbf16> to vector<16x16xbf16>
    %74 = vector.extract_strided_slice %31 {offsets = [0, 80], sizes = [16, 8], strides = [1, 1]} : vector<16x96xbf16> to vector<16x8xbf16>
    %cst_27 = arith.constant dense<0.000000e+00> : vector<16x8xf32>
    %75 = tpu.matmul %73, %74, %cst_27 {dimension_numbers = #tpu.dot_dimension_numbers<[1], [0], [0], [1], [0, 0, 1, 1], [], []>} : vector<16x16xbf16>, vector<16x8xbf16>, vector<16x8xf32> -> vector<16x8xf32>
    %c16 = arith.constant 16 : index
    %c0_28 = arith.constant 0 : index
    %76 = vector.load %arg4[%c16, %c0_28] : memref<32x32xf32, #tpu.memory_space<vmem>>, vector<8x32xf32>
    %77 = arith.truncf %75 : vector<16x8xf32> to vector<16x8xbf16>
    %78 = arith.truncf %76 : vector<8x32xf32> to vector<8x32xbf16>
    %cst_29 = arith.constant dense<0.000000e+00> : vector<16x32xf32>
    %79 = tpu.matmul %77, %78, %cst_29 {dimension_numbers = #tpu.dot_dimension_numbers<[1], [0], [0], [1], [0, 0, 1, 1], [], []>} : vector<16x8xbf16>, vector<8x32xbf16>, vector<16x32xf32> -> vector<16x32xf32>
    %80 = arith.addf %72, %79 : vector<16x32xf32>
    %81 = vector.extract_strided_slice %57 {offsets = [48, 0], sizes = [16, 16], strides = [1, 1]} : vector<64x16xbf16> to vector<16x16xbf16>
    %82 = vector.extract_strided_slice %31 {offsets = [0, 88], sizes = [16, 8], strides = [1, 1]} : vector<16x96xbf16> to vector<16x8xbf16>
    %cst_30 = arith.constant dense<0.000000e+00> : vector<16x8xf32>
    %83 = tpu.matmul %81, %82, %cst_30 {dimension_numbers = #tpu.dot_dimension_numbers<[1], [0], [0], [1], [0, 0, 1, 1], [], []>} : vector<16x16xbf16>, vector<16x8xbf16>, vector<16x8xf32> -> vector<16x8xf32>
    %c24 = arith.constant 24 : index
    %c0_31 = arith.constant 0 : index
    %84 = vector.load %arg4[%c24, %c0_31] : memref<32x32xf32, #tpu.memory_space<vmem>>, vector<8x32xf32>
    %85 = arith.truncf %83 : vector<16x8xf32> to vector<16x8xbf16>
    %86 = arith.truncf %84 : vector<8x32xf32> to vector<8x32xbf16>
    %cst_32 = arith.constant dense<0.000000e+00> : vector<16x32xf32>
    %87 = tpu.matmul %85, %86, %cst_32 {dimension_numbers = #tpu.dot_dimension_numbers<[1], [0], [0], [1], [0, 0, 1, 1], [], []>} : vector<16x8xbf16>, vector<8x32xbf16>, vector<16x32xf32> -> vector<16x32xf32>
    %88 = arith.addf %80, %87 : vector<16x32xf32>
    %89 = arith.addf %0, %88 : vector<16x32xf32>
    %c4 = arith.constant 4 : index
    %c0_33 = arith.constant 0 : index
    %90 = vector.load %arg2[%c4, %c0_33] : memref<8x128xf32, #tpu.memory_space<vmem>>, vector<1x32xf32>
    %91 = vector.broadcast %90 : vector<1x32xf32> to vector<16x32xf32>
    %92 = arith.addf %89, %91 : vector<16x32xf32>
    %c2 = arith.constant 2 : index
    %c0_34 = arith.constant 0 : index
    %93 = vector.load %arg2[%c2, %c0_34] : memref<8x128xf32, #tpu.memory_space<vmem>>, vector<1x32xf32>
    %c3 = arith.constant 3 : index
    %c0_35 = arith.constant 0 : index
    %94 = vector.load %arg2[%c3, %c0_35] : memref<8x128xf32, #tpu.memory_space<vmem>>, vector<1x32xf32>
    %cst_36 = arith.constant dense<0.000000e+00> : vector<16xf32>
    %95 = vector.multi_reduction <add>, %92, %cst_36 [1] : vector<16x32xf32> to vector<16xf32>
    %96 = vector.shape_cast %95 : vector<16xf32> to vector<16x1xf32>
    %cst_37 = arith.constant 3.200000e+01 : f32
    %97 = vector.broadcast %cst_37 : f32 to vector<16x1xf32>
    %98 = arith.divf %96, %97 : vector<16x1xf32>
    %99 = vector.broadcast %98 : vector<16x1xf32> to vector<16x32xf32>
    %100 = arith.subf %92, %99 : vector<16x32xf32>
    %101 = arith.mulf %100, %100 : vector<16x32xf32>
    %cst_38 = arith.constant dense<0.000000e+00> : vector<16xf32>
    %102 = vector.multi_reduction <add>, %101, %cst_38 [1] : vector<16x32xf32> to vector<16xf32>
    %103 = vector.shape_cast %102 : vector<16xf32> to vector<16x1xf32>
    %cst_39 = arith.constant 3.200000e+01 : f32
    %104 = vector.broadcast %cst_39 : f32 to vector<16x1xf32>
    %105 = arith.divf %103, %104 : vector<16x1xf32>
    %106 = vector.broadcast %98 : vector<16x1xf32> to vector<16x32xf32>
    %107 = arith.subf %92, %106 : vector<16x32xf32>
    %cst_40 = arith.constant 9.99999974E-6 : f32
    %108 = vector.broadcast %cst_40 : f32 to vector<16x1xf32>
    %109 = arith.addf %105, %108 : vector<16x1xf32>
    %110 = math.rsqrt %109 : vector<16x1xf32>
    %111 = vector.broadcast %110 : vector<16x1xf32> to vector<16x32xf32>
    %112 = arith.mulf %107, %111 : vector<16x32xf32>
    %113 = vector.broadcast %93 : vector<1x32xf32> to vector<16x32xf32>
    %114 = arith.mulf %112, %113 : vector<16x32xf32>
    %115 = vector.broadcast %94 : vector<1x32xf32> to vector<16x32xf32>
    %116 = arith.addf %114, %115 : vector<16x32xf32>
    %117 = arith.truncf %116 : vector<16x32xf32> to vector<16x32xbf16>
    %c0_41 = arith.constant 0 : index
    %c0_42 = arith.constant 0 : index
    %118 = vector.load %arg5[%c0_41, %c0_42] : memref<32x128xbf16, #tpu.memory_space<vmem>>, vector<32x128xbf16>
    %cst_43 = arith.constant dense<0.000000e+00> : vector<16x128xf32>
    %119 = tpu.matmul %117, %118, %cst_43 {dimension_numbers = #tpu.dot_dimension_numbers<[1], [0], [0], [1], [0, 0, 1, 1], [], []>} : vector<16x32xbf16>, vector<32x128xbf16>, vector<16x128xf32> -> vector<16x128xf32>
    %c7 = arith.constant 7 : index
    %c0_44 = arith.constant 0 : index
    %120 = vector.load %arg2[%c7, %c0_44] : memref<8x128xf32, #tpu.memory_space<vmem>>, vector<1x128xf32>
    %121 = vector.broadcast %120 : vector<1x128xf32> to vector<16x128xf32>
    %122 = arith.addf %119, %121 : vector<16x128xf32>
    %cst_45 = arith.constant 5.000000e-01 : f32
    %123 = vector.broadcast %cst_45 : f32 to vector<16x128xf32>
    %124 = arith.mulf %123, %122 : vector<16x128xf32>
    %cst_46 = arith.constant 4.471500e-02 : f32
    %125 = vector.broadcast %cst_46 : f32 to vector<16x128xf32>
    %126 = arith.mulf %125, %122 : vector<16x128xf32>
    %127 = arith.mulf %126, %122 : vector<16x128xf32>
    %128 = arith.mulf %127, %122 : vector<16x128xf32>
    %129 = arith.addf %122, %128 : vector<16x128xf32>
    %cst_47 = arith.constant 0.797884583 : f32
    %130 = vector.broadcast %cst_47 : f32 to vector<16x128xf32>
    %131 = arith.mulf %130, %129 : vector<16x128xf32>
    %132 = math.tanh %131 : vector<16x128xf32>
    %cst_48 = arith.constant 1.000000e+00 : f32
    %133 = vector.broadcast %cst_48 : f32 to vector<16x128xf32>
    %134 = arith.addf %133, %132 : vector<16x128xf32>
    %135 = arith.mulf %124, %134 : vector<16x128xf32>
    %136 = arith.truncf %135 : vector<16x128xf32> to vector<16x128xbf16>
    %c0_49 = arith.constant 0 : index
    %c0_50 = arith.constant 0 : index
    %137 = vector.load %arg6[%c0_49, %c0_50] : memref<128x32xbf16, #tpu.memory_space<vmem>>, vector<128x32xbf16>
    %cst_51 = arith.constant dense<0.000000e+00> : vector<16x32xf32>
    %138 = tpu.matmul %136, %137, %cst_51 {dimension_numbers = #tpu.dot_dimension_numbers<[1], [0], [0], [1], [0, 0, 1, 1], [], []>} : vector<16x128xbf16>, vector<128x32xbf16>, vector<16x32xf32> -> vector<16x32xf32>
    %c5 = arith.constant 5 : index
    %c0_52 = arith.constant 0 : index
    %139 = vector.load %arg2[%c5, %c0_52] : memref<8x128xf32, #tpu.memory_space<vmem>>, vector<1x32xf32>
    %140 = vector.broadcast %139 : vector<1x32xf32> to vector<16x32xf32>
    %141 = arith.addf %138, %140 : vector<16x32xf32>
    %142 = arith.addf %92, %141 : vector<16x32xf32>
    %c0_53 = arith.constant 0 : index
    %c0_54 = arith.constant 0 : index
    %143 = vector.load %arg7[%c0_53, %c0_54] : memref<16x32xf32, #tpu.memory_space<vmem>>, vector<16x32xf32>
    tpu.vector_store %arg7[%c0_53, %c0_54], %142 {strides = array<i32>} : memref<16x32xf32, #tpu.memory_space<vmem>>, vector<16x32xf32>,
    return
  }
}

</mosaic_0001>

<bundles_post_ra>
// kernel: tpu_custom_call.1
= control target key start
LH: loop header
LB: loop body
LE: loop exit
PB: predicated region body
PF: predicated region fallthrough
CT: control target
= control target key end

     0   :  { %vm32_vm0 = vcmask 261120   ;;  %s1696_s0 = inlined_call_operand.vmem [shape: f32[16,32], index: 0, kind: input, shape index: {}]   ;;  %s1697_s1 = inlined_call_operand.vmem [shape: f32[64,16], index: 1, kind: input, shape index: {}]   ;;  %s1698_s2 = inlined_call_operand.vmem [shape: f32[8,128], index: 2, kind: input, shape index: {}]   ;;  %s1699_s3 = inlined_call_operand.vmem [shape: bf16[32,96], index: 3, kind: input, shape index: {}]   ;;  %s1700_s4 = inlined_call_operand.vmem [shape: f32[32,32], index: 4, kind: input, shape index: {}]   ;;  %s1701_s5 = inlined_call_operand.vmem [shape: bf16[32,128], index: 5, kind: input, shape index: {}]   ;;  %s1702_s6 = inlined_call_operand.vmem [shape: bf16[128,32], index: 6, kind: input, shape index: {}]   ;;  %s1703_s7 = inlined_call_operand.hbm [shape: f32[16,32], index: 7, kind: output, shape index: {}]  }
   0x1   :  { %v1445_v0 = vld [vmem:[%s1696_s0] sm:$0xff]  ;;  %v1450_v1 = vld [vmem:[%s1696_s0 + $0x8] sm:$0xff] }
   0x2   :  { %v33_v2 = vsel %vm32_vm0, %v1445_v0, 0.0  ;;  %v36_v3 = vsel %vm32_vm0, %v1450_v1, 0.0 }
   0x3   :  { %34 = vadd.xlane.f32.xlu0 %v33_v2 }
   0x7   :  { %37 = vadd.xlane.f32.xlu0 %v36_v3 }
   0x8   :  { %12 = vsyncpa [#allocation3], 0  ;;  %v1306_v14 = vld [vmem:[%s1699_s3] sm:$0xff]   ;;  %v1386_v15 = vmov 0.0   ;;  %v1307_v16 = vld [vmem:[%s1699_s3 + $0x8] sm:$0xff]   ;;  %vm1387_vm1 = vmmov 0  }
   0x9   :  { %1182 = vmatprep.subr.bf16.mxu1 %v1386_v15  ;;  %1208 = vmatprep.subr.bf16.mxu0 %v1386_v15  ;;  %v1109_v25 = vld [vmem:[%s1698_s2] ss:$0 sm:$0xff]  ;;  %v1110_v29 = vld [vmem:[%s1698_s2 + $0x1] ss:$0 sm:$0xff]  ;;  %v1111_v34 = vld [vmem:[%s1698_s2 + $0x6] ss:$0 sm:$0xff] }
   0xa   :  { %1183 = vmatpush3.bf16.msra.mxu1 %v1306_v14  ;;  %1186 = vmatprep.mubr.msk.bf16.mxu1 %vm1387_vm1, %v1386_v15  ;;  %s1388_s13 = smov 88   ;;  %s1389_s14 = smov 96   ;;  %vm142_vm2 = vcmask 64512   ;;  %v345_v57 = vld [vmem:[%s1697_s1 + $0x10] sm:$0xff]  ;;  %v346_v59 = vld [vmem:[%s1697_s1 + $0x18] sm:$0xff]  ;;  %vm359_vm3 = vcmask 130048  }
   0xb   :  { %1184 = vmatprep.subr.bf16.mxu1 %v1386_v15  ;;  %1210 = vmatprep.mubr.msk.bf16.mxu0 %vm1387_vm1, %v1386_v15  ;;  %s1390_s15 = smov 120   ;;  %s1391_s16 = smov 112   ;;  %vm555_vm4 = vcmask 1043456  }
   0xc   :  { %s1392_s17 = smov 80   ;;  %s1393_s18 = smov 104  }
   0xd   :  { %s1394_s19 = smov 72   ;;  %s1395_s24 = smov 56  }
   0xe   :  { %1185 = vmatpush3.bf16.msra.mxu1 %v1307_v16  ;;  %s1396_s27 = smov 48   ;;  %s1399_s22 = smov [#allocation2]  }
   0xf   :  { %1190 = vmatprep.subr.bf16.mxu1 %v1386_v15  ;;  %s1098_s23 = sshll.u32 %s1399_s22, 4  ;;  %s1099_s23 = int_to_ptr.vmem [resolvable:$true] %s1098_s23 }
  0x10   :  { %p1367_p1 = scmp.lt.s32.totalorder %s1099_s23, %s1099_s23 }
  0x90   :  { %v35_v4 = vpop.xlane.xlu0 %34 }
  0x91   :  { %v40_v5 = vmul.f32 0.03125, %v35_v4 }
  0x93   :  { %v42_v6 = vsub.f32 %v1445_v0, %v40_v5 }
  0x94   :  { %v38_v7 = vpop.xlane.xlu0 %37 }
  0x95   :  { %v41_v8 = vmul.f32 0.03125, %v38_v7  ;;  %v44_v9 = vmul.f32 %v42_v6, %v42_v6 }
  0x97   :  { %v43_v10 = vsub.f32 %v1450_v1, %v41_v8  ;;  %v46_v11 = vsel %vm32_vm0, %v44_v9, 0.0 }
  0x98   :  { %47 = vadd.xlane.f32.xlu1 %v46_v11 }
  0x99   :  { %v45_v12 = vmul.f32 %v43_v10, %v43_v10 }
  0x9b   :  { %v49_v13 = vsel %vm32_vm0, %v45_v12, 0.0 }
  0x9c   :  { %50 = vadd.xlane.f32.xlu1 %v49_v13  ;;  %v349_v13 = vld [vmem:[%s1697_s1 + $0x30] sm:$0xff] }
 0x125   :  { %v48_v17 = vpop.xlane.xlu1 %47 }
 0x126   :  { %v52_v18 = vmul.f32 0.03125, %v48_v17 }
 0x128   :  { %v54_v19 = vadd.f32 1e-05, %v52_v18 }
 0x129   :  { %v51_v20 = vpop.xlane.xlu1 %50 }
 0x12a   :  { %1318 = vrsqrt.f32 %v54_v19  ;;  %v53_v21 = vmul.f32 0.03125, %v51_v20 }
 0x12c   :  { %v55_v22 = vadd.f32 1e-05, %v53_v21 }
 0x12e   :  { %1320 = vrsqrt.f32 %v55_v22 }
 0x134   :  { %v1319_v23 = vpop.eup %1318 }
 0x135   :  { %v58_v24 = vmul.f32 %v1319_v23, %v42_v6 }
 0x137   :  { %v64_v28 = vmul.f32 %v1109_v25, %v58_v24 }
 0x138   :  { %v1321_v26 = vpop.eup %1320 }
 0x139   :  { %v59_v27 = vmul.f32 %v1321_v26, %v43_v10  ;;  %v70_v31 = vadd.f32 %v1110_v29, %v64_v28 }
 0x13b   :  { %v65_v30 = vmul.f32 %v1109_v25, %v59_v27  ;;  %v343_v27 = vld [vmem:[%s1697_s1] sm:$0xff] }
 0x13d   :  { %v71_v32 = vadd.f32 %v1110_v29, %v65_v30  ;;  %v344_v30 = vld [vmem:[%s1697_s1 + $0x8] sm:$0xff] }
 0x13f   :  { %v72_v33 = vpack.c.bf16 %v71_v32, %v70_v31 }
 0x141   :  { %1187 = vmatmul.mubr.msk.bf16.vlgmr.msra.gmra.mrb[0].mxu1 %vm32_vm0, %v72_v33  ;;  %v347_v33 = vld [vmem:[%s1697_s1 + $0x20] sm:$0xff] }
 0x142   :  { %1192 = vmatprep.mubr.msk.bf16.mxu1 %vm1387_vm1, %v1386_v15 }
 0x214   :  { %v131_v35 = vpop.f32.mrb[0].mxu1 }
 0x215   :  { %v1188_v36 = vpop.f32.mrb[1].mxu1  ;;  %v132_v38 = vadd.f32 %v1111_v34, %v131_v35 }
 0x216   :  { %v134_v37 = vpop.f32.mrb[2].mxu1  ;;  %v348_v36 = vld [vmem:[%s1697_s1 + $0x28] sm:$0xff] }
 0x217   :  { %v135_v39 = vadd.f32 %v1111_v34, %v134_v37  ;;  %v1189_v40 = vpop.f32.mrb[3].mxu1 }
 0x219   :  { %v1486_v41 = vpack.c.bf16 %v135_v39, %v132_v38  ;;  %v350_v39 = vld [vmem:[%s1697_s1 + $0x38] sm:$0xff]  ;;  %s1397_s1 = smov 64  }
 0x21b   :  { %192 = vrot.lane.b32.xlu1 %v1486_v41, %s1388_s13  ;;  %140 = vrot.lane.b32.xlu0 %v1486_v41, %s1389_s14  ;;  %s1398_s13 = smov 40  }
 0x21f   :  { %190 = vrot.lane.b32.xlu1 %v1486_v41, %s1390_s15  ;;  %241 = vrot.lane.b32.xlu0 %v1486_v41, %s1391_s16 }
 0x223   :  { %243 = vrot.lane.b32.xlu1 %v1486_v41, %s1392_s17  ;;  %292 = vrot.lane.b32.xlu0 %v1486_v41, %s1393_s18 }
 0x227   :  { %294 = vrot.lane.b32.xlu1 %v1486_v41, %s1394_s19 }
 0x28d   :  { %v193_v42 = vpop.permute.xlu1 %192  ;;  %v141_v43 = vpop.permute.xlu0 %140 }
 0x28e   :  { %v147_v44 = vsel %vm142_vm2, %v141_v43, 0  ;;  %v198_v47 = vsel %vm142_vm2, %v193_v42, 0 }
 0x28f   :  { %1191 = vmatpush3.bf16.xpose.msra.mxu1 %v147_v44 }
 0x290   :  { %1196 = vmatprep.subr.bf16.mxu1 %v1386_v15 }
 0x291   :  { %v191_v45 = vpop.permute.xlu1 %190  ;;  %v242_v50 = vpop.permute.xlu0 %241 }
 0x295   :  { %v244_v46 = vpop.permute.xlu1 %243  ;;  %v293_v52 = vpop.permute.xlu0 %292 }
 0x296   :  { %1193 = vmatmul.mubr.msk.bf16.vlgmr.msra.gmra.mrb[4].mxu1 %vm142_vm2, %v1486_v41  ;;  %v249_v51 = vsel %vm142_vm2, %v244_v46, 0 }
 0x297   :  { %1197 = vmatpush3.bf16.xpose.msra.mxu1 %v198_v47  ;;  %1198 = vmatprep.mubr.msk.bf16.mxu1 %vm1387_vm1, %v1386_v15 }
 0x298   :  { %1202 = vmatprep.subr.bf16.mxu1 %v1386_v15 }
 0x299   :  { %v295_v48 = vpop.permute.xlu1 %294 }
 0x29a   :  { %v300_v49 = vsel %vm142_vm2, %v295_v48, 0 }
 0x29b   :  { %1209 = vmatpush3.bf16.xpose.msra.mxu0 %v300_v49 }
 0x29c   :  { %1220 = vmatprep.subr.bf16.mxu0 %v1386_v15 }
 0x29e   :  { %1199 = vmatmul.mubr.msk.bf16.vlgmr.msra.gmra.mrb[8].mxu1 %vm142_vm2, %v191_v45 }
 0x29f   :  { %1203 = vmatpush3.bf16.xpose.msra.mxu1 %v249_v51  ;;  %1204 = vmatprep.mubr.msk.bf16.mxu1 %vm1387_vm1, %v1386_v15 }
 0x2a0   :  { %1214 = vmatprep.subr.bf16.mxu1 %v1386_v15 }
 0x2a2   :  { %1211 = vmatmul.mubr.msk.bf16.vlgmr.msra.gmra.mrb[0].mxu0 %vm142_vm2, %v293_v52 }
 0x2a3   :  { %1222 = vmatprep.mubr.msk.bf16.mxu0 %vm1387_vm1, %v1386_v15 }
 0x2a6   :  { %1205 = vmatmul.mubr.msk.bf16.vlgmr.msra.gmra.mrb[12].mxu1 %vm142_vm2, %v242_v50 }
 0x2a7   :  { %1216 = vmatprep.mubr.msk.bf16.mxu1 %vm1387_vm1, %v1386_v15 }
 0x369   :  { %v183_v53 = vpop.f32.mrb[4].mxu1 }
 0x36a   :  { %v1194_v54 = vpop.f32.mrb[5].mxu1  ;;  %v351_v28 = vadd.f32 %v343_v27, %v183_v53 }
 0x36b   :  { %v186_v55 = vpop.f32.mrb[6].mxu1 }
 0x36c   :  { %v1195_v56 = vpop.f32.mrb[7].mxu1  ;;  %v352_v31 = vadd.f32 %v344_v30, %v186_v55  ;;  %v360_v32 = vsel %vm359_vm3, %v351_v28, -inf }
 0x36e   :  { %v363_v35 = vsel %vm359_vm3, %v352_v31, -inf }
 0x371   :  { %v234_v58 = vpop.f32.mrb[8].mxu1 }
 0x372   :  { %v353_v60 = vadd.f32 %v345_v57, %v234_v58  ;;  %v1200_v61 = vpop.f32.mrb[9].mxu1 }
 0x373   :  { %v237_v62 = vpop.f32.mrb[10].mxu1 }
 0x374   :  { %v354_v63 = vadd.f32 %v346_v59, %v237_v62  ;;  %v1201_v2 = vpop.f32.mrb[11].mxu1  ;;  %v366_v3 = vsel %vm359_vm3, %v353_v60, -inf }
 0x375   :  { %v336_v4 = vpop.f32.mrb[0].mxu0  ;;  %367 = vmax.xlane.f32.xlu1 %v366_v3 }
 0x376   :  { %v1212_v5 = vpop.f32.mrb[1].mxu0  ;;  %v369_v6 = vsel %vm359_vm3, %v354_v63, -inf  ;;  %v357_v14 = vadd.f32 %v349_v13, %v336_v4 }
 0x377   :  { %v339_v7 = vpop.f32.mrb[2].mxu0  ;;  %370 = vmax.xlane.f32.xlu0 %v369_v6 }
 0x378   :  { %v1213_v8 = vpop.f32.mrb[3].mxu0  ;;  %v378_v16 = vsel %vm359_vm3, %v357_v14, -inf  ;;  %v358_v40 = vadd.f32 %v350_v39, %v339_v7 }
 0x379   :  { %v285_v9 = vpop.f32.mrb[12].mxu1 }
 0x37a   :  { %v1206_v10 = vpop.f32.mrb[13].mxu1  ;;  %v355_v34 = vadd.f32 %v347_v33, %v285_v9  ;;  %v381_v43 = vsel %vm359_vm3, %v358_v40, -inf }
 0x37b   :  { %v288_v11 = vpop.f32.mrb[14].mxu1 }
 0x37c   :  { %v1207_v12 = vpop.f32.mrb[15].mxu1  ;;  %v356_v37 = vadd.f32 %v348_v36, %v288_v11  ;;  %v372_v38 = vsel %vm359_vm3, %v355_v34, -inf }
 0x37e   :  { %v375_v42 = vsel %vm359_vm3, %v356_v37, -inf }
 0x386   :  { %502 = vrot.lane.b32.xlu1 %v1486_v41, %s1395_s24  ;;  %s1362_s24 = scalar_lea.vmem %s1099_s23, 256 }
 0x387   :  { %p1363_p0 = scmp.ne.s32.totalorder %s1099_s23, %s1362_s24  ;;  %p1368_p2 = scmp.lt.s32.totalorder %s1362_s24, %s1362_s24 }
 0x389   :  { %p1369_p3 = por %p1368_p2, %p1367_p1 }
 0x38b   :  { %p1370_p4 = pnand %p1369_p3, %p1363_p0 }
 0x3aa   :  { %379 = vmax.xlane.f32.xlu1 %v378_v16 }
 0x3bb   :  { %647 = vrot.lane.b32.xlu1 %v1486_v41, %s1396_s27 }
 0x402   :  { %v368_v17 = vpop.xlane.xlu1 %367 }
 0x403   :  { %v386_v18 = vsub.f32 %v353_v60, %v368_v17 }
 0x404   :  { %v371_v19 = vpop.xlane.xlu0 %370 }
 0x405   :  { %v396_v20 = vmul.f32 1.442695, %v386_v18  ;;  %v387_v21 = vsub.f32 %v354_v63, %v371_v19 }
 0x406   :  { %v503_v22 = vpop.permute.xlu1 %502 }
 0x407   :  { %1322 = vpow2.f32 %v396_v20  ;;  %v398_v23 = vmul.f32 1.442695, %v387_v21  ;;  %1221 = vmatpush3.bf16.msra.mxu0 %v503_v22 }
 0x408   :  { %1232 = vmatprep.subr.bf16.mxu0 %v1386_v15 }
 0x409   :  { %1324 = vpow2.f32 %v398_v23 }
 0x411   :  { %v1323_v24 = vpop.eup %1322 }
 0x412   :  { %v414_v25 = vsel %vm359_vm3, %v1323_v24, 0.0 }
 0x413   :  { %v1325_v26 = vpop.eup %1324  ;;  %415 = vadd.xlane.f32.xlu0 %v414_v25 }
 0x414   :  { %v417_v29 = vsel %vm359_vm3, %v1325_v26, 0.0 }
 0x417   :  { %418 = vadd.xlane.f32.xlu0 %v417_v29 }
 0x41b   :  { %361 = vmax.xlane.f32.xlu0 %v360_v32 }
 0x41f   :  { %364 = vmax.xlane.f32.xlu0 %v363_v35 }
 0x423   :  { %373 = vmax.xlane.f32.xlu0 %v372_v38 }
 0x427   :  { %376 = vmax.xlane.f32.xlu0 %v375_v42 }
 0x42b   :  { %382 = vmax.xlane.f32.xlu0 %v381_v43 }
 0x437   :  { %v380_v46 = vpop.xlane.xlu1 %379 }
 0x438   :  { %v390_v49 = vsub.f32 %v357_v14, %v380_v46 }
 0x43a   :  { %v404_v55 = vmul.f32 1.442695, %v390_v49 }
 0x4a0   :  { %v416_v44 = vpop.xlane.xlu0 %415 }
 0x4a1   :  { %1326 = vrcp.f32 %v416_v44 }
 0x4a4   :  { %v419_v45 = vpop.xlane.xlu0 %418 }
 0x4a5   :  { %1328 = vrcp.f32 %v419_v45 }
 0x4a8   :  { %v362_v47 = vpop.xlane.xlu0 %361 }
 0x4a9   :  { %v384_v48 = vsub.f32 %v351_v28, %v362_v47 }
 0x4ab   :  { %v392_v50 = vmul.f32 1.442695, %v384_v48  ;;  %v1327_v52 = vpop.eup %1326 }
 0x4ac   :  { %v365_v51 = vpop.xlane.xlu0 %364  ;;  %v442_v57 = vmul.f32 %v1327_v52, %v1323_v24  ;;  %v499_v52 = vld [vmem:[%s1700_s4] sm:$0xff] }
 0x4ad   :  { %1330 = vpow2.f32 %v392_v50  ;;  %v385_v53 = vsub.f32 %v352_v31, %v365_v51 }
 0x4af   :  { %v1329_v54 = vpop.eup %1328  ;;  %v394_v56 = vmul.f32 1.442695, %v385_v53  ;;  %v501_v53 = vpack.c.bf16 %v499_v52, %v499_v52  ;;  %v1308_v52 = vld [vmem:[%s1701_s5] sm:$0xff]  }
 0x4b0   :  { %v443_v58 = vmul.f32 %v1329_v54, %v1325_v26  ;;  %v374_v59 = vpop.xlane.xlu0 %373  ;;  %v549_v26 = vld [vmem:[%s1700_s4 + $0x8] sm:$0xff] }
 0x4b1   :  { %1332 = vpow2.f32 %v394_v56  ;;  %v388_v63 = vsub.f32 %v355_v34, %v374_v59  ;;  %v551_v30 = vpack.c.bf16 %v549_v26, %v549_v26  ;;  %v604_v54 = vsel %vm555_vm4, %v501_v53, 0  ;;  %v1309_v53 = vld [vmem:[%s1701_s5 + $0x8] sm:$0xff]  }
 0x4b2   :  { %v449_v60 = vpack.c.bf16 %v443_v58, %v442_v57  ;;  %1334 = vpow2.f32 %v404_v55  ;;  %v694_v55 = vld [vmem:[%s1700_s4 + $0x10] sm:$0xff] }
 0x4b3   :  { %v400_v6 = vmul.f32 1.442695, %v388_v63  ;;  %v557_v33 = vsel %vm555_vm4, %v551_v30, 0  ;;  %v696_v56 = vpack.c.bf16 %v694_v55, %v694_v55 }
 0x4b4   :  { %1223 = vmatmul.mubr.msk.bf16.vlgmr.msra.gmra.mrb[4].mxu0 %vm359_vm3, %v449_v60  ;;  %v377_v61 = vpop.xlane.xlu0 %376 }
 0x4b5   :  { %1234 = vmatprep.mubr.msk.bf16.mxu0 %vm1387_vm1, %v1386_v15  ;;  %v389_v7 = vsub.f32 %v356_v37, %v377_v61  ;;  %1233 = vmatpush3.bf16.msra.mxu0 %v604_v54 }
 0x4b6   :  { %1244 = vmatprep.subr.bf16.mxu0 %v1386_v15 }
 0x4b7   :  { %v1331_v62 = vpop.eup %1330  ;;  %v402_v11 = vmul.f32 1.442695, %v389_v7 }
 0x4b8   :  { %v383_v2 = vpop.xlane.xlu0 %382  ;;  %v408_v3 = vsel %vm359_vm3, %v1331_v62, 0.0 }
 0x4b9   :  { %v391_v4 = vsub.f32 %v358_v40, %v383_v2  ;;  %409 = vadd.xlane.f32.xlu0 %v408_v3  ;;  %v648_v40 = vpop.permute.xlu1 %647 }
 0x4bb   :  { %v1333_v5 = vpop.eup %1332  ;;  %v406_v8 = vmul.f32 1.442695, %v391_v4 }
 0x4bc   :  { %v411_v9 = vsel %vm359_vm3, %v1333_v5, 0.0  ;;  %v1558_v10 = vpop.eup %1334 }
 0x4bd   :  { %1336 = vpow2.f32 %v406_v8  ;;  %412 = vadd.xlane.f32.xlu0 %v411_v9  ;;  %v426_v12 = vsel %vm359_vm3, %v1558_v10, 0.0 }
 0x4be   :  { %1338 = vpow2.f32 %v400_v6 }
 0x4bf   :  { %1340 = vpow2.f32 %v402_v11 }
 0x4c1   :  { %427 = vadd.xlane.f32.xlu0 %v426_v12 }
 0x4c7   :  { %v1337_v13 = vpop.eup %1336 }
 0x4c8   :  { %v429_v14 = vsel %vm359_vm3, %v1337_v13, 0.0  ;;  %v1339_v16 = vpop.eup %1338 }
 0x4c9   :  { %430 = vadd.xlane.f32.xlu0 %v429_v14  ;;  %v420_v17 = vsel %vm359_vm3, %v1339_v16, 0.0  ;;  %v1341_v18 = vpop.eup %1340 }
 0x4ca   :  { %v423_v19 = vsel %vm359_vm3, %v1341_v18, 0.0 }
 0x4cd   :  { %421 = vadd.xlane.f32.xlu0 %v420_v17 }
 0x4d1   :  { %424 = vadd.xlane.f32.xlu0 %v423_v19 }
 0x4e7   :  { %452 = vrot.lane.b32.xlu0 %v1486_v41, %s1397_s1 }
 0x4eb   :  { %746 = vrot.lane.b32.xlu0 %v1486_v41, %s1398_s13 }
 0x546   :  { %v410_v20 = vpop.xlane.xlu0 %409 }
 0x54a   :  { %v413_v21 = vpop.xlane.xlu0 %412 }
 0x54b   :  { %1342 = vrcp.f32 %v413_v21 }
 0x54c   :  { %1344 = vrcp.f32 %v410_v20 }
 0x54e   :  { %v428_v22 = vpop.xlane.xlu0 %427 }
 0x555   :  { %v1343_v25 = vpop.eup %1342 }
 0x556   :  { %v431_v23 = vpop.xlane.xlu0 %430  ;;  %v1345_v28 = vpop.eup %1344  ;;  %v441_v29 = vmul.f32 %v1343_v25, %v1333_v5  ;;  %v793_v5 = vld [vmem:[%s1700_s4 + $0x18] sm:$0xff] }
 0x557   :  { %v440_v31 = vmul.f32 %v1345_v28, %v1331_v62  ;;  %v701_v62 = vsel %vm555_vm4, %v696_v56, 0  ;;  %v795_v6 = vpack.c.bf16 %v793_v5, %v793_v5 }
 0x559   :  { %v448_v41 = vpack.c.bf16 %v441_v29, %v440_v31  ;;  %v800_v12 = vsel %vm555_vm4, %v795_v6, 0 }
 0x55a   :  { %v422_v24 = vpop.xlane.xlu0 %421 }
 0x55e   :  { %v425_v27 = vpop.xlane.xlu0 %424 }
 0x55f   :  { %1346 = vrcp.f32 %v425_v27 }
 0x560   :  { %1348 = vrcp.f32 %v422_v24 }
 0x561   :  { %1350 = vrcp.f32 %v431_v23 }
 0x562   :  { %v453_v32 = vpop.permute.xlu0 %452  ;;  %1352 = vrcp.f32 %v428_v22 }
 0x563   :  { %1215 = vmatpush3.bf16.msra.mxu1 %v453_v32 }
 0x564   :  { %1226 = vmatprep.subr.bf16.mxu1 %v1386_v15 }
 0x566   :  { %1217 = vmatmul.mubr.msk.bf16.vlgmr.msra.gmra.mrb[16].mxu1 %vm359_vm3, %v448_v41  ;;  %v747_v47 = vpop.permute.xlu0 %746 }
 0x567   :  { %1227 = vmatpush3.bf16.msra.mxu1 %v557_v33  ;;  %1228 = vmatprep.mubr.msk.bf16.mxu1 %vm1387_vm1, %v1386_v15  ;;  %v1127_v33 = vld [vmem:[%s1698_s2 + $0x4] ss:$0 sm:$0xff] }
 0x568   :  { %1238 = vmatprep.subr.bf16.mxu1 %v1386_v15 }
 0x569   :  { %v1347_v39 = vpop.eup %1346 }
 0x56a   :  { %v1349_v42 = vpop.eup %1348  ;;  %v445_v43 = vmul.f32 %v1347_v39, %v1341_v18 }
 0x56b   :  { %v444_v44 = vmul.f32 %v1349_v42, %v1339_v16  ;;  %v1351_v46 = vpop.eup %1350 }
 0x56c   :  { %v1353_v48 = vpop.eup %1352  ;;  %v447_v49 = vmul.f32 %v1351_v46, %v1337_v13 }
 0x56d   :  { %v450_v45 = vpack.c.bf16 %v445_v43, %v444_v44  ;;  %v446_v50 = vmul.f32 %v1353_v48, %v1558_v10 }
 0x56f   :  { %v451_v51 = vpack.c.bf16 %v447_v49, %v446_v50 }
 0x587   :  { %v542_v34 = vpop.f32.mrb[4].mxu0 }
 0x588   :  { %v1224_v35 = vpop.f32.mrb[5].mxu0 }
 0x589   :  { %v545_v36 = vpop.f32.mrb[6].mxu0 }
 0x58a   :  { %v550_v37 = vpack.c.bf16 %v545_v36, %v542_v34  ;;  %v1225_v38 = vpop.f32.mrb[7].mxu0 }
 0x58c   :  { %1229 = vmatmul.mubr.msk.bf16.vlgmr.msra.gmra.mrb[20].mxu1 %vm142_vm2, %v550_v37 }
 0x58d   :  { %1239 = vmatpush3.bf16.msra.mxu1 %v648_v40  ;;  %1240 = vmatprep.mubr.msk.bf16.mxu1 %vm1387_vm1, %v1386_v15 }
 0x58e   :  { %1250 = vmatprep.subr.bf16.mxu1 %v1386_v15 }
 0x594   :  { %1241 = vmatmul.mubr.msk.bf16.vlgmr.msra.gmra.mrb[24].mxu1 %vm359_vm3, %v450_v45 }
 0x595   :  { %1251 = vmatpush3.bf16.msra.mxu1 %v747_v47  ;;  %1252 = vmatprep.mubr.msk.bf16.mxu1 %vm1387_vm1, %v1386_v15 }
 0x596   :  { %1262 = vmatprep.subr.bf16.mxu1 %v1386_v15 }
 0x59c   :  { %1253 = vmatmul.mubr.msk.bf16.vlgmr.msra.gmra.mrb[28].mxu1 %vm359_vm3, %v451_v51 }
 0x59d   :  { %1266 = vmatprep.mubr.msk.bf16.mxu1 %vm1387_vm1, %v1386_v15  ;;  %1263 = vmatpush3.bf16.msra.mxu1 %v1308_v52 }
 0x59e   :  { %1264 = vmatprep.subr.bf16.mxu1 %v1386_v15 }
 0x5a1   :  { %1265 = vmatpush3.bf16.msra.mxu1 %v1309_v53 }
 0x639   :  { %v492_v57 = vpop.f32.mrb[16].mxu1 }
 0x63a   :  { %v1218_v58 = vpop.f32.mrb[17].mxu1 }
 0x63b   :  { %v495_v59 = vpop.f32.mrb[18].mxu1 }
 0x63c   :  { %v500_v60 = vpack.c.bf16 %v495_v59, %v492_v57  ;;  %v1219_v61 = vpop.f32.mrb[19].mxu1 }
 0x63d   :  { %v1128_v61 = vld [vmem:[%s1698_s2 + $0x2] ss:$0 sm:$0xff] }
 0x63e   :  { %1235 = vmatmul.mubr.msk.bf16.vlgmr.msra.gmra.mrb[8].mxu0 %vm142_vm2, %v500_v60 }
 0x63f   :  { %1245 = vmatpush3.bf16.msra.mxu0 %v701_v62  ;;  %1246 = vmatprep.mubr.msk.bf16.mxu0 %vm1387_vm1, %v1386_v15 }
 0x640   :  { %1256 = vmatprep.subr.bf16.mxu0 %v1386_v15 }
 0x65f   :  { %v593_v63 = vpop.f32.mrb[20].mxu1 }
 0x660   :  { %v1230_v2 = vpop.f32.mrb[21].mxu1 }
 0x661   :  { %v596_v3 = vpop.f32.mrb[22].mxu1 }
 0x662   :  { %v1231_v4 = vpop.f32.mrb[23].mxu1 }
 0x663   :  { %v1129_v4 = vld [vmem:[%s1698_s2 + $0x3] ss:$0 sm:$0xff] }
 0x667   :  { %v687_v7 = vpop.f32.mrb[24].mxu1 }
 0x668   :  { %v1242_v8 = vpop.f32.mrb[25].mxu1 }
 0x669   :  { %v690_v9 = vpop.f32.mrb[26].mxu1 }
 0x66a   :  { %v695_v10 = vpack.c.bf16 %v690_v9, %v687_v7  ;;  %v1243_v11 = vpop.f32.mrb[27].mxu1  ;;  %v1310_v9 = vld [vmem:[%s1702_s6] sm:$0xff]  }
 0x66b   :  { %v1312_v11 = vld [vmem:[%s1702_s6 + $0x10] sm:$0xff]  }
 0x66c   :  { %1247 = vmatmul.mubr.msk.bf16.vlgmr.msra.gmra.mrb[12].mxu0 %vm142_vm2, %v695_v10  ;;  %v1311_v10 = vld [vmem:[%s1702_s6 + $0x8] sm:$0xff]  }
 0x66d   :  { %1257 = vmatpush3.bf16.msra.mxu0 %v800_v12  ;;  %1258 = vmatprep.mubr.msk.bf16.mxu0 %vm1387_vm1, %v1386_v15  ;;  %v1313_v12 = vld [vmem:[%s1702_s6 + $0x18] sm:$0xff]  }
 0x66e   :  { %1270 = vmatprep.subr.bf16.mxu0 %v1386_v15 }
 0x66f   :  { %v786_v13 = vpop.f32.mrb[28].mxu1 }
 0x670   :  { %v1254_v14 = vpop.f32.mrb[29].mxu1 }
 0x671   :  { %v789_v16 = vpop.f32.mrb[30].mxu1  ;;  %v1315_v14 = vld [vmem:[%s1702_s6 + $0x28] sm:$0xff]  }
 0x672   :  { %v794_v17 = vpack.c.bf16 %v789_v16, %v786_v13  ;;  %v1255_v18 = vpop.f32.mrb[31].mxu1  ;;  %v1314_v13 = vld [vmem:[%s1702_s6 + $0x20] sm:$0xff]   ;;  %v1316_v16 = vld [vmem:[%s1702_s6 + $0x30] sm:$0xff]  }
 0x673   :  { %v1130_v18 = vld [vmem:[%s1698_s2 + $0x7] ss:$0 sm:$0xff] }
 0x674   :  { %1259 = vmatmul.mubr.msk.bf16.vlgmr.msra.gmra.mrb[16].mxu0 %vm142_vm2, %v794_v17  ;;  %v1317_v17 = vld [vmem:[%s1702_s6 + $0x38] sm:$0xff]  }
 0x675   :  { %1286 = vmatprep.mubr.msk.bf16.mxu0 %vm1387_vm1, %v1386_v15  ;;  %1271 = vmatpush3.bf16.msra.mxu0 %v1310_v9 }
 0x676   :  { %1272 = vmatprep.subr.bf16.mxu0 %v1386_v15 }
 0x679   :  { %1273 = vmatpush3.bf16.msra.mxu0 %v1311_v10 }
 0x67a   :  { %1274 = vmatprep.subr.bf16.mxu0 %v1386_v15 }
 0x67d   :  { %1275 = vmatpush3.bf16.msra.mxu0 %v1312_v11 }
 0x67e   :  { %1276 = vmatprep.subr.bf16.mxu0 %v1386_v15 }
 0x681   :  { %1277 = vmatpush3.bf16.msra.mxu0 %v1313_v12 }
 0x682   :  { %1278 = vmatprep.subr.bf16.mxu0 %v1386_v15 }
 0x685   :  { %1279 = vmatpush3.bf16.msra.mxu0 %v1314_v13 }
 0x686   :  { %1280 = vmatprep.subr.bf16.mxu0 %v1386_v15 }
 0x689   :  { %1281 = vmatpush3.bf16.msra.mxu0 %v1315_v14 }
 0x68a   :  { %1282 = vmatprep.subr.bf16.mxu0 %v1386_v15 }
 0x68d   :  { %1283 = vmatpush3.bf16.msra.mxu0 %v1316_v16 }
 0x68e   :  { %1284 = vmatprep.subr.bf16.mxu0 %v1386_v15 }
 0x691   :  { %1285 = vmatpush3.bf16.msra.mxu0 %v1317_v17 }
 0x711   :  { %v640_v19 = vpop.f32.mrb[8].mxu0 }
 0x712   :  { %v641_v20 = vadd.f32 %v640_v19, %v593_v63  ;;  %v1236_v21 = vpop.f32.mrb[9].mxu0 }
 0x713   :  { %v643_v22 = vpop.f32.mrb[10].mxu0 }
 0x714   :  { %v644_v23 = vadd.f32 %v643_v22, %v596_v3  ;;  %v1237_v24 = vpop.f32.mrb[11].mxu0 }
 0x73f   :  { %v737_v25 = vpop.f32.mrb[12].mxu0 }
 0x740   :  { %v744_v26 = vadd.f32 %v737_v25, %v641_v20  ;;  %v1248_v27 = vpop.f32.mrb[13].mxu0 }
 0x741   :  { %v740_v28 = vpop.f32.mrb[14].mxu0 }
 0x742   :  { %v745_v29 = vadd.f32 %v740_v28, %v644_v23  ;;  %v1249_v30 = vpop.f32.mrb[15].mxu0 }
 0x747   :  { %v836_v31 = vpop.f32.mrb[16].mxu0 }
 0x748   :  { %v843_v32 = vadd.f32 %v836_v31, %v744_v26  ;;  %v1260_v41 = vpop.f32.mrb[17].mxu0 }
 0x749   :  { %v839_v34 = vpop.f32.mrb[18].mxu0 }
 0x74a   :  { %v845_v35 = vadd.f32 %v843_v32, %v1445_v0  ;;  %v844_v36 = vadd.f32 %v839_v34, %v745_v29  ;;  %v1261_v37 = vpop.f32.mrb[19].mxu0 }
 0x74c   :  { %v1616_v38 = vadd.f32 %v1127_v33, %v845_v35  ;;  %v846_v39 = vadd.f32 %v844_v36, %v1450_v1 }
 0x74e   :  { %v1619_v40 = vadd.f32 %v1127_v33, %v846_v39  ;;  %v856_v42 = vsel %vm32_vm0, %v1616_v38, 0.0 }
 0x74f   :  { %857 = vadd.xlane.f32.xlu1 %v856_v42 }
 0x750   :  { %v859_v43 = vsel %vm32_vm0, %v1619_v40, 0.0 }
 0x751   :  { %860 = vadd.xlane.f32.xlu0 %v859_v43 }
 0x7dc   :  { %v858_v44 = vpop.xlane.xlu1 %857 }
 0x7dd   :  { %v862_v45 = vmul.f32 0.03125, %v858_v44 }
 0x7de   :  { %v861_v46 = vpop.xlane.xlu0 %860 }
 0x7df   :  { %v864_v0 = vsub.f32 %v1616_v38, %v862_v45  ;;  %v863_v47 = vmul.f32 0.03125, %v861_v46  ;;  %v1134_v45 = vld [vmem:[%s1698_s2 + $0x5] ss:$0 sm:$0xff] }
 0x7e1   :  { %v865_v48 = vsub.f32 %v1619_v40, %v863_v47  ;;  %v866_v49 = vmul.f32 %v864_v0, %v864_v0 }
 0x7e3   :  { %v868_v1 = vsel %vm32_vm0, %v866_v49, 0.0  ;;  %v867_v50 = vmul.f32 %v865_v48, %v865_v48 }
 0x7e4   :  { %869 = vadd.xlane.f32.xlu0 %v868_v1 }
 0x7e5   :  { %v871_v51 = vsel %vm32_vm0, %v867_v50, 0.0 }
 0x7e6   :  { %872 = vadd.xlane.f32.xlu1 %v871_v51 }
 0x871   :  { %v870_v54 = vpop.xlane.xlu0 %869 }
 0x872   :  { %v874_v55 = vmul.f32 0.03125, %v870_v54 }
 0x873   :  { %v873_v56 = vpop.xlane.xlu1 %872 }
 0x874   :  { %v876_v57 = vadd.f32 1e-05, %v874_v55  ;;  %v875_v58 = vmul.f32 0.03125, %v873_v56 }
 0x876   :  { %1354 = vrsqrt.f32 %v876_v57  ;;  %v877_v59 = vadd.f32 1e-05, %v875_v58 }
 0x878   :  { %1356 = vrsqrt.f32 %v877_v59 }
 0x880   :  { %v1355_v60 = vpop.eup %1354 }
 0x881   :  { %v880_v62 = vmul.f32 %v1355_v60, %v864_v0 }
 0x882   :  { %v1357_v63 = vpop.eup %1356 }
 0x883   :  { %v886_v2 = vmul.f32 %v1128_v61, %v880_v62  ;;  %v881_v3 = vmul.f32 %v1357_v63, %v865_v48 }
 0x885   :  { %v887_v5 = vmul.f32 %v1128_v61, %v881_v3  ;;  %v892_v6 = vadd.f32 %v1129_v4, %v886_v2 }
 0x887   :  { %v893_v7 = vadd.f32 %v1129_v4, %v887_v5 }
 0x889   :  { %v894_v8 = vpack.c.bf16 %v893_v7, %v892_v6 }
 0x88b   :  { %1267 = vmatmul.mubr.msk.bf16.vlgmr.msra.gmra.mrb[32].mxu1 %vm32_vm0, %v894_v8 }
 0x95e   :  { %v953_v19 = vpop.f32.mrb[32].mxu1 }
 0x95f   :  { %v954_v20 = vadd.f32 %v1130_v18, %v953_v19  ;;  %v1268_v21 = vpop.f32.mrb[33].mxu1 }
 0x960   :  { %v956_v22 = vpop.f32.mrb[34].mxu1 }
 0x961   :  { %v962_v23 = vmul.f32 0.044715, %v954_v20  ;;  %v957_v24 = vadd.f32 %v1130_v18, %v956_v22  ;;  %v1269_v25 = vpop.f32.mrb[35].mxu1  ;;  %v960_v36 = vmul.f32 0.5, %v954_v20 }
 0x963   :  { %v964_v26 = vmul.f32 %v962_v23, %v954_v20  ;;  %v963_v27 = vmul.f32 0.044715, %v957_v24  ;;  %v961_v37 = vmul.f32 0.5, %v957_v24 }
 0x965   :  { %v966_v28 = vmul.f32 %v964_v26, %v954_v20  ;;  %v965_v29 = vmul.f32 %v963_v27, %v957_v24 }
 0x967   :  { %v968_v30 = vadd.f32 %v966_v28, %v954_v20  ;;  %v967_v31 = vmul.f32 %v965_v29, %v957_v24 }
 0x969   :  { %v970_v32 = vmul.f32 0.7978846, %v968_v30  ;;  %v969_v15 = vadd.f32 %v967_v31, %v957_v24 }
 0x96b   :  { %1358 = vtanh.f32 %v970_v32  ;;  %v971_v41 = vmul.f32 0.7978846, %v969_v15 }
 0x96d   :  { %1360 = vtanh.f32 %v971_v41 }
 0x975   :  { %v1359_v33 = vpop.eup %1358 }
 0x976   :  { %v974_v34 = vadd.f32 1.0, %v1359_v33 }
 0x977   :  { %v1361_v35 = vpop.eup %1360 }
 0x978   :  { %v975_v39 = vadd.f32 1.0, %v1361_v35  ;;  %v976_v42 = vmul.f32 %v974_v34, %v960_v36 }
 0x97a   :  { %v977_v43 = vmul.f32 %v975_v39, %v961_v37 }
 0x97c   :  { %v978_v44 = vpack.c.bf16 %v977_v43, %v976_v42 }
 0x97e   :  { %1287 = vmatmul.mubr.bf16.vlgmr.msra.gmra.mrb[20].mxu0 %v978_v44 }
 0xa51   :  { %v1082_v46 = vpop.f32.mrb[20].mxu0 }
 0xa52   :  { %v1083_v0 = vadd.f32 %v1134_v45, %v1082_v46  ;;  %v1288_v47 = vpop.f32.mrb[21].mxu0 }
 0xa53   :  { %v1085_v48 = vpop.f32.mrb[22].mxu0 }
 0xa54   :  { %v1089_v49 = vadd.f32 %v1083_v0, %v1616_v38  ;;  %v1086_v1 = vadd.f32 %v1134_v45, %v1085_v48  ;;  %v1289_v50 = vpop.f32.mrb[23].mxu0 }
 0xa56   :  { %1091 = vst.msk [vmem:[#allocation2] sm:$0xff] %vm32_vm0, %v1089_v49  ;;  %v1090_v51 = vadd.f32 %v1086_v1, %v1619_v40 }
 0xa58   :  { %1092 = vst.msk [vmem:[#allocation2 + $0x8] sm:$0xff] %vm32_vm0, %v1090_v51 }
 0xa59   :  { %1373 = shalt.err (!%p1370_p4)
}
 0xa5a   :  { %s1374_s26 = scalar_lea.hbm %s1703_s7, 256 }
 0xa5b   :  { %p1375_p5 = scmp.ne.s32.totalorder %s1703_s7, %s1374_s26  ;;  %p1378_p6 = scmp.lt.u32.totalorder %s1374_s26, %s1703_s7 }
 0xa5d   :  { %p1380_p7 = pnand %p1378_p6, %p1375_p5 }
 0xa5f   :  { %1383 = shalt.err (!%p1380_p7)
}
 0xa60   :  { %s1400_s29 = smov 128   ;;  %s1401_s30 = smov 8  }
 0xa61   :  { %1104 = dma.vmem_to_hbm [thread:$0]  %s1099_s23, 256, %s1703_s7, [#allocation3], %s1400_s29, %s1400_s29, %s1401_s30  }
 0xa62   :  { %1384 = dma.done.wait [#allocation3], 256  }
 0xa63   :  { %1385 = vsyncadd [#allocation3], 4294967040 }
 0xa64   :  { %1108 = vsyncpa [#allocation3], 1 }

</bundles_post_ra>
